<compile_context>
chip_gen: v7x
topology: tpu7x:2x2x1
jax: 0.10.0
libtpu: 0.0.40
codegen_flags: <defaults>
</compile_context>

<pallas_src>
import functools

import jax
import jax.numpy as jnp
from jax.experimental import pallas as pl
from jax.experimental.pallas import tpu as pltpu


def mlp_kernel(w1_ref, b1_ref, w2_ref, b2_ref, x_ref, o_ref):
    """One batch tile: o = linear2(relu(linear1(x))) in the transposed layout
    (features leading, batch filling sublanes x lanes); f32, VPU-only FMAs."""
    in_f = x_ref.shape[0]            # 3
    hid = b1_ref.shape[0]            # 4

    # Hoist all SMEM scalar reads out of the unrolled FMA chain (17 reads total).
    w1 = [[w1_ref[k, j] for j in range(hid)] for k in range(in_f)]
    b1 = [b1_ref[j] for j in range(hid)]
    w2 = [w2_ref[j] for j in range(hid)]
    b2 = b2_ref[0]

    # Load each feature row once as a dense (8, tb//8) slab; reuse across hidden units.
    x_rows = [x_ref[k] for k in range(in_f)]

    y = None
    for j in range(hid):             # static unroll: (3 FMAs + bias + relu + FMA) x 4
        h = x_rows[0] * w1[0][j]
        for k in range(1, in_f):
            h = h + x_rows[k] * w1[k][j]
        h = jnp.maximum(h + b1[j], 0.0)      # bias + ReLU
        term = h * w2[j]
        y = term if y is None else y + term
    o_ref[...] = (y + b2)[None].astype(o_ref.dtype)


def _round_up(n, m):
    return -(-n // m) * m


@functools.partial(jax.jit, static_argnames=("tb",))
def mlp_forward(x, w1, b1, w2, b2, *, tb=32768):
    """x: (B, 3) f32. w1: (3, 4), b1: (4,), w2: (4, 1), b2: (1,). Returns (B, 1).

    Weights are the PyTorch ones pre-transposed to (in, out) so y = x @ W + b.
    """
    B, in_f = x.shape
    out_f = w2.shape[1]

    LANE_TILE = 8 * 128   # one full (sublane, lane) slab = 1024 batch elements

    b_ceil = _round_up(max(B, 1), LANE_TILE)
    # Clamp the batch tile: multiple of 1024, no wider than the padded batch, and
    # keep >=2 balanced grid steps when possible so the "parallel" batch axis can
    # shard across v7x's two TensorCores (harmless on v5e/v6e).
    tb = max(LANE_TILE, (min(tb, b_ceil) // LANE_TILE) * LANE_TILE)
    if b_ceil >= 2 * LANE_TILE:
        tb = min(tb, _round_up(b_ceil // 2, LANE_TILE))
    assert tb % LANE_TILE == 0, tb

    grid_b = pl.cdiv(B, tb)
    b_pad = grid_b * tb
    lanes = b_pad // 8
    tl = tb // 8                      # block lane width (multiple of 128)

    # Feature-major, (8, lanes)-slabbed layout; zero-pad the ragged tail (sliced off).
    # TODO(synk): ideally the producer keeps activations feature-major (3, B) so this
    # relayout (and the trailing transpose) disappears; kept here for a (B, 3) API.
    # TODO(synk): on v6e/v7x a bf16 x stream (f32 accumulation in-kernel) would halve
    # HBM input bytes; kept f32 for exact parity with the PyTorch reference numerics.
    x_t = jnp.pad(x.T.astype(jnp.float32), ((0, 0), (0, b_pad - B)))
    x_t = x_t.reshape(in_f, 8, lanes)

    out_t = pl.pallas_call(
        mlp_kernel,
        out_shape=jax.ShapeDtypeStruct((out_f, 8, lanes), jnp.float32),
        grid=(grid_b,),
        in_specs=[
            # Tiny weights/biases: SMEM-resident, loaded once, no per-step re-DMA.
            pl.BlockSpec(memory_space=pltpu.MemorySpace.SMEM),   # w1 (3, 4)
            pl.BlockSpec(memory_space=pltpu.MemorySpace.SMEM),   # b1 (4,)
            pl.BlockSpec(memory_space=pltpu.MemorySpace.SMEM),   # w2 flat (4,)
            pl.BlockSpec(memory_space=pltpu.MemorySpace.SMEM),   # b2 (1,)
            # Streaming, double-buffered (3, 8, tb//8) slabs of x (all sublanes used).
            pl.BlockSpec((in_f, 8, tl), lambda i: (0, 0, i)),
        ],
        out_specs=pl.BlockSpec((out_f, 8, tl), lambda i: (0, 0, i)),
        compiler_params=pltpu.CompilerParams(
            dimension_semantics=("parallel",),      # shard batch grid across TCs on v7x
            vmem_limit_bytes=32 * 1024 * 1024,
        ),
        cost_estimate=pl.CostEstimate(
            flops=36 * b_pad,
            transcendentals=0,
            bytes_accessed=(in_f + out_f) * 4 * b_pad,
        ),
    )(
        w1.astype(jnp.float32),
        b1.astype(jnp.float32),
        w2.reshape(-1).astype(jnp.float32),
        b2.astype(jnp.float32),
        x_t,
    )

    return out_t.reshape(out_f, b_pad)[:, :B].T   # back to PyTorch's (B, 1)


if __name__ == "__main__":
    key = jax.random.PRNGKey(0)
    kx, kw1, kb1, kw2, kb2 = jax.random.split(key, 5)

    # Matches MLP: Linear(3, 4) -> ReLU -> Linear(4, 1), input torch.rand(2, 3).
    # Weights kept pre-transposed to (in, out) so the forward is y = x @ W + b.
    x = jax.random.uniform(kx, (2, 3), dtype=jnp.float32)          # torch.rand(2, 3)
    w1 = jax.random.normal(kw1, (3, 4), dtype=jnp.float32) * 0.5   # linear1 weight.T
    b1 = jax.random.normal(kb1, (4,), dtype=jnp.float32) * 0.1     # linear1 bias
    w2 = jax.random.normal(kw2, (4, 1), dtype=jnp.float32) * 0.5   # linear2 weight.T
    b2 = jax.random.normal(kb2, (1,), dtype=jnp.float32) * 0.1     # linear2 bias

    out = mlp_forward(x, w1, b1, w2, b2)
    jax.block_until_ready(out)

    ref = jnp.maximum(x @ w1 + b1, 0.0) @ w2 + b2
    assert out.shape == (2, 1)
    assert jnp.allclose(out, ref, atol=1e-5), (out, ref)

    # Multi-step grid + ragged-tail path (B not a tile multiple).
    xb = jax.random.uniform(kx, (1300, 3), dtype=jnp.float32)
    outb = mlp_forward(xb, w1, b1, w2, b2)
    jax.block_until_ready(outb)
    refb = jnp.maximum(xb @ w1 + b1, 0.0) @ w2 + b2
    assert outb.shape == (1300, 1)
    assert jnp.allclose(outb, refb, atol=1e-5)

    # Larger batch: exercises the big-tile clamp (>=2 balanced steps) and pipelining.
    xc = jax.random.uniform(kx, (50000, 3), dtype=jnp.float32)
    outc = mlp_forward(xc, w1, b1, w2, b2)
    jax.block_until_ready(outc)
    refc = jnp.maximum(xc @ w1 + b1, 0.0) @ w2 + b2
    assert outc.shape == (50000, 1)
    assert jnp.allclose(outc, refc, atol=1e-5)

    print("KERNEL_OK")
</pallas_src>

<mosaic_0001>
module attributes {stable_mosaic.version = 11 : i64} {
  func.func @mlp_kernel(%arg0: i32, %arg1: memref<3x4xf32, #tpu.memory_space<smem>>, %arg2: memref<4xf32, #tpu.memory_space<smem>>, %arg3: memref<4xf32, #tpu.memory_space<smem>>, %arg4: memref<1xf32, #tpu.memory_space<smem>>, %arg5: memref<3x8x128xf32, #tpu.memory_space<vmem>>, %arg6: memref<1x8x128xf32, #tpu.memory_space<vmem>>) attributes {dimension_semantics = [#tpu.dimension_semantics<parallel>], iteration_bounds = array<i64: 1>, scalar_prefetch = 0 : i64, scratch_operands = 0 : i64, tpu.core_type = #tpu.core_type<tc>, window_params = [{transform_indices = @transform_0, window_bounds = array<i64: 3, 4>}, {transform_indices = @transform_1, window_bounds = array<i64: 4>}, {transform_indices = @transform_2, window_bounds = array<i64: 4>}, {transform_indices = @transform_3, window_bounds = array<i64: 1>}, {transform_indices = @transform_4, window_bounds = array<i64: 3, 8, 128>}, {transform_indices = @transform_5, window_bounds = array<i64: 1, 8, 128>}]} {
    %c0 = arith.constant 0 : index
    %c0_0 = arith.constant 0 : index
    %0 = memref.load %arg1[%c0, %c0_0] : memref<3x4xf32, #tpu.memory_space<smem>>
    %c0_1 = arith.constant 0 : index
    %c1 = arith.constant 1 : index
    %1 = memref.load %arg1[%c0_1, %c1] : memref<3x4xf32, #tpu.memory_space<smem>>
    %c0_2 = arith.constant 0 : index
    %c2 = arith.constant 2 : index
    %2 = memref.load %arg1[%c0_2, %c2] : memref<3x4xf32, #tpu.memory_space<smem>>
    %c0_3 = arith.constant 0 : index
    %c3 = arith.constant 3 : index
    %3 = memref.load %arg1[%c0_3, %c3] : memref<3x4xf32, #tpu.memory_space<smem>>
    %c1_4 = arith.constant 1 : index
    %c0_5 = arith.constant 0 : index
    %4 = memref.load %arg1[%c1_4, %c0_5] : memref<3x4xf32, #tpu.memory_space<smem>>
    %c1_6 = arith.constant 1 : index
    %c1_7 = arith.constant 1 : index
    %5 = memref.load %arg1[%c1_6, %c1_7] : memref<3x4xf32, #tpu.memory_space<smem>>
    %c1_8 = arith.constant 1 : index
    %c2_9 = arith.constant 2 : index
    %6 = memref.load %arg1[%c1_8, %c2_9] : memref<3x4xf32, #tpu.memory_space<smem>>
    %c1_10 = arith.constant 1 : index
    %c3_11 = arith.constant 3 : index
    %7 = memref.load %arg1[%c1_10, %c3_11] : memref<3x4xf32, #tpu.memory_space<smem>>
    %c2_12 = arith.constant 2 : index
    %c0_13 = arith.constant 0 : index
    %8 = memref.load %arg1[%c2_12, %c0_13] : memref<3x4xf32, #tpu.memory_space<smem>>
    %c2_14 = arith.constant 2 : index
    %c1_15 = arith.constant 1 : index
    %9 = memref.load %arg1[%c2_14, %c1_15] : memref<3x4xf32, #tpu.memory_space<smem>>
    %c2_16 = arith.constant 2 : index
    %c2_17 = arith.constant 2 : index
    %10 = memref.load %arg1[%c2_16, %c2_17] : memref<3x4xf32, #tpu.memory_space<smem>>
    %c2_18 = arith.constant 2 : index
    %c3_19 = arith.constant 3 : index
    %11 = memref.load %arg1[%c2_18, %c3_19] : memref<3x4xf32, #tpu.memory_space<smem>>
    %c0_20 = arith.constant 0 : index
    %12 = memref.load %arg2[%c0_20] : memref<4xf32, #tpu.memory_space<smem>>
    %c1_21 = arith.constant 1 : index
    %13 = memref.load %arg2[%c1_21] : memref<4xf32, #tpu.memory_space<smem>>
    %c2_22 = arith.constant 2 : index
    %14 = memref.load %arg2[%c2_22] : memref<4xf32, #tpu.memory_space<smem>>
    %c3_23 = arith.constant 3 : index
    %15 = memref.load %arg2[%c3_23] : memref<4xf32, #tpu.memory_space<smem>>
    %c0_24 = arith.constant 0 : index
    %16 = memref.load %arg3[%c0_24] : memref<4xf32, #tpu.memory_space<smem>>
    %c1_25 = arith.constant 1 : index
    %17 = memref.load %arg3[%c1_25] : memref<4xf32, #tpu.memory_space<smem>>
    %c2_26 = arith.constant 2 : index
    %18 = memref.load %arg3[%c2_26] : memref<4xf32, #tpu.memory_space<smem>>
    %c3_27 = arith.constant 3 : index
    %19 = memref.load %arg3[%c3_27] : memref<4xf32, #tpu.memory_space<smem>>
    %c0_28 = arith.constant 0 : index
    %20 = memref.load %arg4[%c0_28] : memref<1xf32, #tpu.memory_space<smem>>
    %c0_29 = arith.constant 0 : index
    %c0_30 = arith.constant 0 : index
    %c0_31 = arith.constant 0 : index
    %21 = vector.load %arg5[%c0_29, %c0_30, %c0_31] : memref<3x8x128xf32, #tpu.memory_space<vmem>>, vector<1x8x128xf32>
    %22 = vector.shape_cast %21 : vector<1x8x128xf32> to vector<8x128xf32>
    %c1_32 = arith.constant 1 : index
    %c0_33 = arith.constant 0 : index
    %c0_34 = arith.constant 0 : index
    %23 = vector.load %arg5[%c1_32, %c0_33, %c0_34] : memref<3x8x128xf32, #tpu.memory_space<vmem>>, vector<1x8x128xf32>
    %24 = vector.shape_cast %23 : vector<1x8x128xf32> to vector<8x128xf32>
    %c2_35 = arith.constant 2 : index
    %c0_36 = arith.constant 0 : index
    %c0_37 = arith.constant 0 : index
    %25 = vector.load %arg5[%c2_35, %c0_36, %c0_37] : memref<3x8x128xf32, #tpu.memory_space<vmem>>, vector<1x8x128xf32>
    %26 = vector.shape_cast %25 : vector<1x8x128xf32> to vector<8x128xf32>
    %27 = vector.broadcast %0 : f32 to vector<8x128xf32>
    %28 = arith.mulf %22, %27 : vector<8x128xf32>
    %29 = vector.broadcast %4 : f32 to vector<8x128xf32>
    %30 = arith.mulf %24, %29 : vector<8x128xf32>
    %31 = arith.addf %28, %30 : vector<8x128xf32>
    %32 = vector.broadcast %8 : f32 to vector<8x128xf32>
    %33 = arith.mulf %26, %32 : vector<8x128xf32>
    %34 = arith.addf %31, %33 : vector<8x128xf32>
    %35 = vector.broadcast %12 : f32 to vector<8x128xf32>
    %36 = arith.addf %34, %35 : vector<8x128xf32>
    %cst = arith.constant 0.000000e+00 : f32
    %37 = vector.broadcast %cst : f32 to vector<8x128xf32>
    %38 = arith.maximumf %36, %37 : vector<8x128xf32>
    %39 = vector.broadcast %16 : f32 to vector<8x128xf32>
    %40 = arith.mulf %38, %39 : vector<8x128xf32>
    %41 = vector.broadcast %1 : f32 to vector<8x128xf32>
    %42 = arith.mulf %22, %41 : vector<8x128xf32>
    %43 = vector.broadcast %5 : f32 to vector<8x128xf32>
    %44 = arith.mulf %24, %43 : vector<8x128xf32>
    %45 = arith.addf %42, %44 : vector<8x128xf32>
    %46 = vector.broadcast %9 : f32 to vector<8x128xf32>
    %47 = arith.mulf %26, %46 : vector<8x128xf32>
    %48 = arith.addf %45, %47 : vector<8x128xf32>
    %49 = vector.broadcast %13 : f32 to vector<8x128xf32>
    %50 = arith.addf %48, %49 : vector<8x128xf32>
    %cst_38 = arith.constant 0.000000e+00 : f32
    %51 = vector.broadcast %cst_38 : f32 to vector<8x128xf32>
    %52 = arith.maximumf %50, %51 : vector<8x128xf32>
    %53 = vector.broadcast %17 : f32 to vector<8x128xf32>
    %54 = arith.mulf %52, %53 : vector<8x128xf32>
    %55 = arith.addf %40, %54 : vector<8x128xf32>
    %56 = vector.broadcast %2 : f32 to vector<8x128xf32>
    %57 = arith.mulf %22, %56 : vector<8x128xf32>
    %58 = vector.broadcast %6 : f32 to vector<8x128xf32>
    %59 = arith.mulf %24, %58 : vector<8x128xf32>
    %60 = arith.addf %57, %59 : vector<8x128xf32>
    %61 = vector.broadcast %10 : f32 to vector<8x128xf32>
    %62 = arith.mulf %26, %61 : vector<8x128xf32>
    %63 = arith.addf %60, %62 : vector<8x128xf32>
    %64 = vector.broadcast %14 : f32 to vector<8x128xf32>
    %65 = arith.addf %63, %64 : vector<8x128xf32>
    %cst_39 = arith.constant 0.000000e+00 : f32
    %66 = vector.broadcast %cst_39 : f32 to vector<8x128xf32>
    %67 = arith.maximumf %65, %66 : vector<8x128xf32>
    %68 = vector.broadcast %18 : f32 to vector<8x128xf32>
    %69 = arith.mulf %67, %68 : vector<8x128xf32>
    %70 = arith.addf %55, %69 : vector<8x128xf32>
    %71 = vector.broadcast %3 : f32 to vector<8x128xf32>
    %72 = arith.mulf %22, %71 : vector<8x128xf32>
    %73 = vector.broadcast %7 : f32 to vector<8x128xf32>
    %74 = arith.mulf %24, %73 : vector<8x128xf32>
    %75 = arith.addf %72, %74 : vector<8x128xf32>
    %76 = vector.broadcast %11 : f32 to vector<8x128xf32>
    %77 = arith.mulf %26, %76 : vector<8x128xf32>
    %78 = arith.addf %75, %77 : vector<8x128xf32>
    %79 = vector.broadcast %15 : f32 to vector<8x128xf32>
    %80 = arith.addf %78, %79 : vector<8x128xf32>
    %cst_40 = arith.constant 0.000000e+00 : f32
    %81 = vector.broadcast %cst_40 : f32 to vector<8x128xf32>
    %82 = arith.maximumf %80, %81 : vector<8x128xf32>
    %83 = vector.broadcast %19 : f32 to vector<8x128xf32>
    %84 = arith.mulf %82, %83 : vector<8x128xf32>
    %85 = arith.addf %70, %84 : vector<8x128xf32>
    %86 = vector.broadcast %20 : f32 to vector<8x128xf32>
    %87 = arith.addf %85, %86 : vector<8x128xf32>
    %88 = vector.shape_cast %87 : vector<8x128xf32> to vector<1x8x128xf32>
    %c0_41 = arith.constant 0 : index
    %c0_42 = arith.constant 0 : index
    %c0_43 = arith.constant 0 : index
    %89 = vector.load %arg6[%c0_41, %c0_42, %c0_43] : memref<1x8x128xf32, #tpu.memory_space<vmem>>, vector<1x8x128xf32>
    tpu.vector_store %arg6[%c0_41, %c0_42, %c0_43], %88 {strides = array<i32>} : memref<1x8x128xf32, #tpu.memory_space<vmem>>, vector<1x8x128xf32>,
    return
  }
  func.func @transform_0(%arg0: i32) -> (i32, i32) {
    %c0_i32 = arith.constant 0 : i32
    %c0_i32_0 = arith.constant 0 : i32
    %c0_i32_1 = arith.constant 0 : i32
    return %c0_i32, %c0_i32_0 : i32, i32
  }
  func.func @transform_1(%arg0: i32) -> i32 {
    %c0_i32 = arith.constant 0 : i32
    %c0_i32_0 = arith.constant 0 : i32
    return %c0_i32 : i32
  }
  func.func @transform_2(%arg0: i32) -> i32 {
    %c0_i32 = arith.constant 0 : i32
    %c0_i32_0 = arith.constant 0 : i32
    return %c0_i32 : i32
  }
  func.func @transform_3(%arg0: i32) -> i32 {
    %c0_i32 = arith.constant 0 : i32
    %c0_i32_0 = arith.constant 0 : i32
    return %c0_i32 : i32
  }
  func.func @transform_4(%arg0: i32) -> (i32, i32, i32) {
    %c0_i32 = arith.constant 0 : i32
    %c0_i32_0 = arith.constant 0 : i32
    %c0_i32_1 = arith.constant 0 : i32
    return %c0_i32, %c0_i32_0, %arg0 : i32, i32, i32
  }
  func.func @transform_5(%arg0: i32) -> (i32, i32, i32) {
    %c0_i32 = arith.constant 0 : i32
    %c0_i32_0 = arith.constant 0 : i32
    %c0_i32_1 = arith.constant 0 : i32
    return %c0_i32, %c0_i32_0, %arg0 : i32, i32, i32
  }
}

</mosaic_0001>

<bundles_post_ra>
// kernel: mlp_forward.1
= control target key start
LH: loop header
LB: loop body
LE: loop exit
PB: predicated region body
PF: predicated region fallthrough
CT: control target
= control target key end

     0   :  { %11 = vsyncpa [#allocation4], 0  ;;  %s305_s0 = inlined_call_operand.vmem [shape: f32[3,4], index: 0, kind: input, shape index: {}]   ;;  %s306_s1 = inlined_call_operand.vmem [shape: f32[4], index: 1, kind: input, shape index: {}]   ;;  %s307_s2 = inlined_call_operand.vmem [shape: f32[4], index: 2, kind: input, shape index: {}]   ;;  %s308_s3 = inlined_call_operand.<no memory space> [shape: f32[1], index: 3, kind: input, shape index: {}]   ;;  %s309_s4 = inlined_call_operand.vmem [shape: f32[3,8,128], index: 4, kind: input, shape index: {}]   ;;  %s310_s5 = inlined_call_operand.vmem [shape: f32[1,8,128], index: 5, kind: output, shape index: {}]  }
   0x1   :  { %12 = vsyncpa [#allocation6], 0  ;;  %s29_s20 = sshll.u32 %s306_s1, 4  ;;  %s19_s23 = sshll.u32 %s305_s0, 4  ;;  %s30_s20 = int_to_ptr.vmem [resolvable:$true] %s29_s20  ;;  %s20_s23 = int_to_ptr.vmem [resolvable:$true] %s19_s23 }
   0x2   :  { %s169_s24 = scalar_lea.vmem %s30_s20, 16  ;;  %p174_p1 = scmp.lt.s32.totalorder %s30_s20, %s30_s20 }
   0x3   :  { %p170_p0 = scmp.ne.s32.totalorder %s30_s20, %s169_s24  ;;  %p175_p2 = scmp.lt.s32.totalorder %s169_s24, %s169_s24 }
   0x5   :  { %p176_p3 = por %p175_p2, %p174_p1 }
   0x7   :  { %p177_p4 = pnand %p176_p3, %p170_p0 }
   0x9   :  { %180 = shalt.err (!%p177_p4)
}
   0xa   :  { %s209_s25 = smov [#allocation5]   ;;  %s181_s26 = scalar_lea.vmem %s20_s23, 64 }
   0xb   :  { %32 = dma.vmem_to_smem %s30_s20, 16, %s209_s25, [#allocation6]  }
   0xc   :  { %p182_p5 = scmp.ne.s32.totalorder %s20_s23, %s181_s26  ;;  %p186_p6 = scmp.lt.s32.totalorder %s20_s23, %s20_s23 }
   0xd   :  { %p187_p7 = scmp.lt.s32.totalorder %s181_s26, %s181_s26 }
   0xf   :  { %p188_p8 = por %p187_p7, %p186_p6 }
  0x11   :  { %p189_p9 = pnand %p188_p8, %p182_p5 }
  0x13   :  { %192 = shalt.err (!%p189_p9)
}
  0x14   :  { %s210_s1 = smov [#allocation3]   ;;  %s39_s28 = sshll.u32 %s307_s2, 4  ;;  %s40_s28 = int_to_ptr.vmem [resolvable:$true] %s39_s28 }
  0x15   :  { %22 = dma.vmem_to_smem %s20_s23, 64, %s210_s1, [#allocation4]  }
  0x16   :  { %s193_s29 = scalar_lea.vmem %s40_s28, 16  ;;  %p198_p11 = scmp.lt.s32.totalorder %s40_s28, %s40_s28 }
  0x17   :  { %p194_p10 = scmp.ne.s32.totalorder %s40_s28, %s193_s29  ;;  %p199_p12 = scmp.lt.s32.totalorder %s193_s29, %s193_s29 }
  0x19   :  { %p200_p13 = por %p199_p12, %p198_p11 }
  0x1b   :  { %p201_p0 = pnand %p200_p13, %p194_p10 }
  0x1d   :  { %204 = shalt.err (!%p201_p0)
}
  0x1e   :  { %s211_s30 = smov [#allocation7]  }
  0x1f   :  { %42 = dma.vmem_to_smem %s40_s28, 16, %s211_s30, [#allocation6]  }
  0x20   :  { %205 = dma.done.wait [#allocation4], 64  }
  0x21   :  { %206 = vsyncadd [#allocation4], 4294967232 }
  0x22   :  { %207 = dma.done.wait [#allocation6], 32  }
  0x23   :  { %208 = vsyncadd [#allocation6], 4294967264 }
  0x24   :  { %56 = sfence }
  0x25   :  { %s57_s6 = sld [smem:[#allocation3]]  ;;  %s147_s7 = sld [smem:[#allocation3 + $0x1]]  ;;  %v78_v0 = vld [vmem:[%s309_s4] sm:$0xff]  ;;  %v164_v1 = vld [vmem:[%s309_s4 + $0x8] sm:$0xff]  ;;  %v165_v8 = vld [vmem:[%s309_s4 + $0x10] sm:$0xff]  ;;  %v138_v57 = vstv %s308_s3 }
  0x26   :  { %s148_s8 = sld [smem:[#allocation3 + $0x2]]  ;;  %s149_s9 = sld [smem:[#allocation3 + $0x3]] }
  0x27   :  { %s150_s2 = sld [smem:[#allocation3 + $0x80]]  ;;  %s151_s10 = sld [smem:[#allocation3 + $0x81]] }
  0x28   :  { %s251_s11 = sld [smem:[#allocation3 + $0x82]]  ;;  %s253_s12 = sld [smem:[#allocation3 + $0x83]] }
  0x29   :  { %s255_s13 = sld [smem:[#allocation3 + $0x100]]  ;;  %s257_s14 = sld [smem:[#allocation3 + $0x101]] }
  0x2a   :  { %s262_s17 = sld [smem:[#allocation3 + $0x102]]  ;;  %s264_s18 = sld [smem:[#allocation3 + $0x103]] }
  0x2b   :  { %s266_s19 = sld [smem:[#allocation5]]  ;;  %s268_s20 = sld [smem:[#allocation5 + $0x1]]  ;;  %v83_v2 = vstv %s57_s6  ;;  %v96_v3 = vstv %s147_s7 }
  0x2c   :  { %s273_s23 = sld [smem:[#allocation5 + $0x2]]  ;;  %v84_v4 = vmul.f32 %v83_v2, %v78_v0  ;;  %v97_v5 = vmul.f32 %v96_v3, %v78_v0  ;;  %v110_v6 = vstv %s148_s8  ;;  %v124_v7 = vstv %s149_s9  ;;  %s275_s24 = sld [smem:[#allocation7]] }
  0x2d   :  { %s277_s25 = sld [smem:[#allocation7 + $0x1]]  ;;  %v85_v9 = vstv %s150_s2  ;;  %v98_v10 = vstv %s151_s10  ;;  %v111_v11 = vmul.f32 %v110_v6, %v78_v0  ;;  %v125_v12 = vmul.f32 %v124_v7, %v78_v0  ;;  %s282_s0 = sld [smem:[#allocation5 + $0x3]] }
  0x2e   :  { %v86_v13 = vmul.f32 %v164_v1, %v85_v9  ;;  %v99_v14 = vmul.f32 %v164_v1, %v98_v10  ;;  %v112_v15 = vstv %s251_s11  ;;  %v126_v16 = vstv %s253_s12  ;;  %s286_s27 = sld [smem:[#allocation7 + $0x2]]  ;;  %s163_s4 = sld [smem:[#allocation7 + $0x3]] }
  0x2f   :  { %v88_v17 = vstv %s255_s13  ;;  %v101_v18 = vstv %s257_s14  ;;  %v113_v19 = vmul.f32 %v164_v1, %v112_v15  ;;  %v127_v20 = vmul.f32 %v164_v1, %v126_v16 }
  0x30   :  { %v87_v21 = vadd.f32 %v86_v13, %v84_v4  ;;  %v89_v22 = vmul.f32 %v165_v8, %v88_v17  ;;  %v100_v23 = vadd.f32 %v99_v14, %v97_v5  ;;  %v102_v24 = vmul.f32 %v165_v8, %v101_v18 }
  0x31   :  { %v91_v25 = vstv %s266_s19  ;;  %v104_v26 = vstv %s268_s20  ;;  %v114_v27 = vadd.f32 %v113_v19, %v111_v11  ;;  %v115_v28 = vstv %s262_s17 }
  0x32   :  { %v90_v29 = vadd.f32 %v89_v22, %v87_v21  ;;  %v103_v30 = vadd.f32 %v102_v24, %v100_v23  ;;  %v116_v31 = vmul.f32 %v165_v8, %v115_v28  ;;  %v118_v32 = vstv %s273_s23 }
  0x33   :  { %v128_v33 = vadd.f32 %v127_v20, %v125_v12  ;;  %v129_v34 = vstv %s264_s18  ;;  %v94_v38 = vstv %s275_s24  ;;  %v107_v39 = vstv %s277_s25 }
  0x34   :  { %v92_v35 = vadd.f32 %v91_v25, %v90_v29  ;;  %v105_v36 = vadd.f32 %v104_v26, %v103_v30  ;;  %v117_v37 = vadd.f32 %v116_v31, %v114_v27  ;;  %v130_v40 = vmul.f32 %v165_v8, %v129_v34 }
  0x35   :  { %v132_v44 = vstv %s282_s0  ;;  %v121_v45 = vstv %s286_s27  ;;  %v135_v53 = vstv %s163_s4 }
  0x36   :  { %v93_v41 = vmax.f32 %v92_v35, 0.0  ;;  %v106_v42 = vmax.f32 %v105_v36, 0.0  ;;  %v119_v43 = vadd.f32 %v118_v32, %v117_v37  ;;  %v131_v46 = vadd.f32 %v130_v40, %v128_v33 }
  0x38   :  { %v95_v47 = vmul.f32 %v94_v38, %v93_v41  ;;  %v108_v48 = vmul.f32 %v107_v39, %v106_v42  ;;  %v120_v49 = vmax.f32 %v119_v43, 0.0  ;;  %v133_v50 = vadd.f32 %v132_v44, %v131_v46 }
  0x3a   :  { %v109_v51 = vadd.f32 %v108_v48, %v95_v47  ;;  %v122_v52 = vmul.f32 %v121_v45, %v120_v49  ;;  %v134_v54 = vmax.f32 %v133_v50, 0.0 }
  0x3c   :  { %v123_v55 = vadd.f32 %v122_v52, %v109_v51  ;;  %v136_v56 = vmul.f32 %v135_v53, %v134_v54 }
  0x3e   :  { %v137_v58 = vadd.f32 %v136_v56, %v123_v55 }
  0x40   :  { %v139_v59 = vadd.f32 %v138_v57, %v137_v58 }
  0x42   :  { %140 = vst [vmem:[%s310_s5] sm:$0xff] %v139_v59 }
  0x43   :  { %145 = vsyncpa [#allocation4], 1 }
  0x44   :  { %146 = vsyncpa [#allocation6], 1 }

</bundles_post_ra>
